<compile_context>
chip_gen: v7x
topology: tpu7x:2x2x1
jax: 0.10.0
libtpu: 0.0.40
codegen_flags: <defaults>
</compile_context>

<pallas_src>
import jax
import jax.numpy as jnp
from jax import lax
from jax.experimental import pallas as pl
from jax.experimental.pallas import tpu as pltpu

C1 = 0.01 ** 2
C2 = 0.03 ** 2

_MIB = 1024 * 1024


def _round_up(x, m):
    return ((x + m - 1) // m) * m


def _vmem_budget():
    """Per-generation sizing: (per-input block bytes, scoped VMEM limit)."""
    try:
        vmem_cap = pltpu.get_tpu_info().vmem_capacity_bytes
    except Exception:
        vmem_cap = 64 * _MIB                      # conservative (v7x-like)
    if vmem_cap >= 100 * _MIB:                    # v5e / v6e: 128 MiB VMEM
        return 4 * _MIB, 64 * _MIB
    return 2 * _MIB, 32 * _MIB                    # v7x: 64 MiB VMEM


def _choose_tiling(n_img, hw, dtype_bytes, block_bytes, use_mxu):
    """Pick (t_img, t_hw, num_hw_chunks, num_img_blocks, tail_valid)."""
    sublane = {4: 8, 2: 16, 1: 32}.get(dtype_bytes, 8)   # native sublane packing

    # Lane chunk: ~32 KiB of row bytes (bounds in-kernel f32 intermediates),
    # balanced so the tail chunk is nearly full; remainder is masked in-kernel.
    t_hw_max = max(128, (32 * 1024 // dtype_bytes) // 128 * 128)
    num_hw_chunks = max(1, -(-hw // t_hw_max))
    t_hw = _round_up(-(-hw // num_hw_chunks), 128)
    num_hw_chunks = -(-hw // t_hw)
    tail_valid = hw - (num_hw_chunks - 1) * t_hw         # in (0, t_hw]

    n_img_cap = _round_up(n_img, sublane)
    t_img = (block_bytes // (t_hw * dtype_bytes)) // sublane * sublane
    t_img = max(sublane, min(t_img, n_img_cap))
    if use_mxu:
        t_img = min(t_img, 128)   # keep the Gram-matmul flops << HBM roofline
    # v7x has 2 TensorCores: make sure there are >= 2 parallel grid steps
    # whenever the problem allows it.
    if t_img >= n_img_cap and num_hw_chunks == 1 and n_img > sublane:
        t_img = max(sublane, _round_up(-(-n_img // 2), sublane))
    num_img_blocks = -(-n_img // t_img)
    return t_img, t_hw, num_hw_chunks, num_img_blocks, tail_valid


def _make_moments_kernel(t_img, t_hw, num_hw_chunks, tail_valid, use_mxu, in_dtype):
    """Build the per-block raw-moments kernel (all tiling params static)."""
    need_mask = tail_valid != t_hw

    def moments(x_raw, y_raw):
        x32 = x_raw.astype(jnp.float32)
        y32 = y_raw.astype(jnp.float32)
        sx = jnp.sum(x32, axis=-1, keepdims=True)
        sy = jnp.sum(y32, axis=-1, keepdims=True)
        sad = jnp.sum(jnp.abs(x32 - y32), axis=-1, keepdims=True)
        if use_mxu:
            # Offload x^2 / y^2 / x*y reductions to the MXU: NT contractions
            # (A @ B^T) with f32 accumulation; only diagonals are kept.
            nt = (((1,), (1,)), ((), ()))
            gxx = lax.dot_general(x_raw, x_raw, nt, preferred_element_type=jnp.float32)
            gyy = lax.dot_general(y_raw, y_raw, nt, preferred_element_type=jnp.float32)
            gxy = lax.dot_general(x_raw, y_raw, nt, preferred_element_type=jnp.float32)
            eye = (lax.broadcasted_iota(jnp.int32, (t_img, t_img), 0)
                   == lax.broadcasted_iota(jnp.int32, (t_img, t_img), 1))
            zero = jnp.zeros((), jnp.float32)
            sxx = jnp.sum(jnp.where(eye, gxx, zero), axis=-1, keepdims=True)
            syy = jnp.sum(jnp.where(eye, gyy, zero), axis=-1, keepdims=True)
            sxy = jnp.sum(jnp.where(eye, gxy, zero), axis=-1, keepdims=True)
        else:
            sxx = jnp.sum(x32 * x32, axis=-1, keepdims=True)
            syy = jnp.sum(y32 * y32, axis=-1, keepdims=True)
            sxy = jnp.sum(x32 * y32, axis=-1, keepdims=True)
        pad = jnp.zeros((t_img, 2), jnp.float32)
        return jnp.concatenate([sx, sy, sxx, syy, sxy, sad, pad], axis=-1)

    def kernel(x_ref, y_ref, o_ref):
        def emit(x_raw, y_raw):
            o_ref[...] = moments(x_raw, y_raw)[None]

        def emit_masked():
            lane = lax.broadcasted_iota(jnp.int32, (t_img, t_hw), 1)
            m = lane < tail_valid
            zero = jnp.zeros((), in_dtype)
            emit(jnp.where(m, x_ref[...], zero), jnp.where(m, y_ref[...], zero))

        if not need_mask:                       # hot path: no masking at all
            emit(x_ref[...], y_ref[...])
        elif num_hw_chunks == 1:                # single (short) chunk: always mask
            emit_masked()
        else:                                   # mask only the tail chunk
            j = pl.program_id(1)

            @pl.when(j < num_hw_chunks - 1)
            def _():
                emit(x_ref[...], y_ref[...])

            @pl.when(j == num_hw_chunks - 1)
            def _():
                emit_masked()

    return kernel


def combined_loss(output, target, alpha=0.5):
    """Pallas TPU implementation of CombinedLoss.forward(output, target)."""
    assert output.shape == target.shape
    B, C, H, W = output.shape
    n_img = B * C
    hw = H * W
    dtype_bytes = jnp.dtype(output.dtype).itemsize
    use_mxu = output.dtype == jnp.bfloat16      # MXU Gram moments for bf16 inputs

    block_bytes, vmem_limit = _vmem_budget()
    t_img, t_hw, num_hw_chunks, num_img_blocks, tail_valid = _choose_tiling(
        n_img, hw, dtype_bytes, block_bytes, use_mxu)
    n_img_pad = num_img_blocks * t_img

    # Native dtype goes through the DMA; cast to f32 only inside the kernel.
    x = output.reshape(n_img, hw)
    y = target.reshape(n_img, hw)

    kernel = _make_moments_kernel(t_img, t_hw, num_hw_chunks, tail_valid,
                                  use_mxu, x.dtype)

    in_spec = pl.BlockSpec((t_img, t_hw), lambda i, j: (i, j))
    out_spec = pl.BlockSpec((1, t_img, 8), lambda i, j: (j, i, 0))

    stats = pl.pallas_call(
        kernel,
        out_shape=jax.ShapeDtypeStruct((num_hw_chunks, n_img_pad, 8), jnp.float32),
        grid=(num_img_blocks, num_hw_chunks),
        in_specs=[in_spec, in_spec],
        out_specs=out_spec,
        compiler_params=pltpu.CompilerParams(
            dimension_semantics=("parallel", "parallel"),
            vmem_limit_bytes=vmem_limit,
        ),
    )(x, y)

    # Tiny O(n_img) combine in plain JAX (keeps alpha out of the kernel).
    # Rows beyond n_img are garbage from padded image blocks and are dropped.
    tot = jnp.sum(stats, axis=0)[:n_img]                  # (n_img, 8)
    sx, sy, sxx, syy, sxy, sad = (tot[:, k] for k in range(6))

    inv_hw = 1.0 / hw
    mu1 = sx * inv_hw
    mu2 = sy * inv_hw
    # TODO(synk): E[x^2]-mu^2 in f32 can cancel for extremely low-contrast
    # images; switch to Chan's chunk-merge variance if exact parity with the
    # centered two-pass reference is ever required.
    sigma1_sq = sxx * inv_hw - mu1 * mu1
    sigma2_sq = syy * inv_hw - mu2 * mu2
    sigma12 = sxy * inv_hw - mu1 * mu2

    ssim_num = (2.0 * mu1 * mu2 + C1) * (2.0 * sigma12 + C2)
    ssim_den = (mu1 * mu1 + mu2 * mu2 + C1) * (sigma1_sq + sigma2_sq + C2)
    ssim_mean = jnp.mean(ssim_num / ssim_den)

    l1_loss = jnp.sum(sad) / (n_img * hw)        # == F.l1_loss (mean over elems)
    ssim_loss = 1.0 - ssim_mean
    return alpha * l1_loss + (1.0 - alpha) * ssim_loss


def _reference_combined_loss(output, target, alpha=0.5):
    """Pure-JAX reference mirroring the PyTorch module."""
    l1 = jnp.mean(jnp.abs(output - target))
    mu1 = output.mean(axis=(2, 3), keepdims=True)
    mu2 = target.mean(axis=(2, 3), keepdims=True)
    s1 = ((output - mu1) ** 2).mean(axis=(2, 3), keepdims=True)
    s2 = ((target - mu2) ** 2).mean(axis=(2, 3), keepdims=True)
    s12 = ((output - mu1) * (target - mu2)).mean(axis=(2, 3), keepdims=True)
    num = (2 * mu1 * mu2 + C1) * (2 * s12 + C2)
    den = (mu1 ** 2 + mu2 ** 2 + C1) * (s1 + s2 + C2)
    ssim_loss = 1.0 - (num / den).mean()
    return alpha * l1 + (1 - alpha) * ssim_loss


if __name__ == "__main__":
    key = jax.random.PRNGKey(0)
    k1, k2, k3, k4, k5, k6 = jax.random.split(key, 6)

    # 1) Small f32 case: single block, no tail masking.
    out1 = jax.random.uniform(k1, (2, 4, 16, 16), dtype=jnp.float32)
    tgt1 = jax.random.uniform(k2, (2, 4, 16, 16), dtype=jnp.float32)
    loss1 = combined_loss(out1, tgt1, alpha=0.5)
    jax.block_until_ready(loss1)
    ref1 = _reference_combined_loss(out1, tgt1, alpha=0.5)
    assert jnp.allclose(loss1, ref1, rtol=5e-4, atol=1e-5), (loss1, ref1)

    # 2) f32 case with several H*W chunks and an in-kernel masked tail chunk
    #    (no wrapper-side padding pass).
    out2 = jax.random.uniform(k3, (2, 2, 272, 272), dtype=jnp.float32)
    tgt2 = jax.random.uniform(k4, (2, 2, 272, 272), dtype=jnp.float32)
    loss2 = combined_loss(out2, tgt2, alpha=0.3)
    jax.block_until_ready(loss2)
    ref2 = _reference_combined_loss(out2, tgt2, alpha=0.3)
    assert jnp.allclose(loss2, ref2, rtol=5e-4, atol=1e-5), (loss2, ref2)

    # 3) bf16 case: MXU Gram-moment path, 2 H*W chunks with masked tail.
    out3 = jax.random.uniform(k5, (2, 8, 136, 136), dtype=jnp.float32).astype(jnp.bfloat16)
    tgt3 = jax.random.uniform(k6, (2, 8, 136, 136), dtype=jnp.float32).astype(jnp.bfloat16)
    loss3 = combined_loss(out3, tgt3, alpha=0.7)
    jax.block_until_ready(loss3)
    ref3 = _reference_combined_loss(out3.astype(jnp.float32),
                                    tgt3.astype(jnp.float32), alpha=0.7)
    assert jnp.allclose(loss3, ref3, rtol=2e-3, atol=1e-4), (loss3, ref3)

    print("KERNEL_OK")
</pallas_src>

<mosaic_0001>
module attributes {stable_mosaic.version = 11 : i64} {
  func.func @kernel(%arg0: i32, %arg1: i32, %arg2: memref<8x256xf32, #tpu.memory_space<vmem>>, %arg3: memref<8x256xf32, #tpu.memory_space<vmem>>, %arg4: memref<1x8x8xf32, #tpu.memory_space<vmem>>) attributes {dimension_semantics = [#tpu.dimension_semantics<parallel>, #tpu.dimension_semantics<parallel>], iteration_bounds = array<i64: 1, 1>, scalar_prefetch = 0 : i64, scratch_operands = 0 : i64, tpu.core_type = #tpu.core_type<tc>, window_params = [{transform_indices = @transform_0, window_bounds = array<i64: 8, 256>}, {transform_indices = @transform_1, window_bounds = array<i64: 8, 256>}, {transform_indices = @transform_2, window_bounds = array<i64: 1, 8, 8>}]} {
    %c0 = arith.constant 0 : index
    %c0_0 = arith.constant 0 : index
    %0 = vector.load %arg2[%c0, %c0_0] : memref<8x256xf32, #tpu.memory_space<vmem>>, vector<8x256xf32>
    %c0_1 = arith.constant 0 : index
    %c0_2 = arith.constant 0 : index
    %1 = vector.load %arg3[%c0_1, %c0_2] : memref<8x256xf32, #tpu.memory_space<vmem>>, vector<8x256xf32>
    %cst = arith.constant dense<0.000000e+00> : vector<8xf32>
    %2 = vector.multi_reduction <add>, %0, %cst [1] : vector<8x256xf32> to vector<8xf32>
    %3 = vector.shape_cast %2 : vector<8xf32> to vector<8x1xf32>
    %cst_3 = arith.constant dense<0.000000e+00> : vector<8xf32>
    %4 = vector.multi_reduction <add>, %1, %cst_3 [1] : vector<8x256xf32> to vector<8xf32>
    %5 = vector.shape_cast %4 : vector<8xf32> to vector<8x1xf32>
    %6 = arith.subf %0, %1 : vector<8x256xf32>
    %7 = math.absf %6 : vector<8x256xf32>
    %cst_4 = arith.constant dense<0.000000e+00> : vector<8xf32>
    %8 = vector.multi_reduction <add>, %7, %cst_4 [1] : vector<8x256xf32> to vector<8xf32>
    %9 = vector.shape_cast %8 : vector<8xf32> to vector<8x1xf32>
    %10 = arith.mulf %0, %0 : vector<8x256xf32>
    %cst_5 = arith.constant dense<0.000000e+00> : vector<8xf32>
    %11 = vector.multi_reduction <add>, %10, %cst_5 [1] : vector<8x256xf32> to vector<8xf32>
    %12 = vector.shape_cast %11 : vector<8xf32> to vector<8x1xf32>
    %13 = arith.mulf %1, %1 : vector<8x256xf32>
    %cst_6 = arith.constant dense<0.000000e+00> : vector<8xf32>
    %14 = vector.multi_reduction <add>, %13, %cst_6 [1] : vector<8x256xf32> to vector<8xf32>
    %15 = vector.shape_cast %14 : vector<8xf32> to vector<8x1xf32>
    %16 = arith.mulf %0, %1 : vector<8x256xf32>
    %cst_7 = arith.constant dense<0.000000e+00> : vector<8xf32>
    %17 = vector.multi_reduction <add>, %16, %cst_7 [1] : vector<8x256xf32> to vector<8xf32>
    %18 = vector.shape_cast %17 : vector<8xf32> to vector<8x1xf32>
    %cst_8 = arith.constant 0.000000e+00 : f32
    %19 = vector.broadcast %cst_8 : f32 to vector<8x2xf32>
    %20 = tpu.concatenate %3, %5, %12, %15, %18, %9, %19 in 1 : vector<8x1xf32>, vector<8x1xf32>, vector<8x1xf32>, vector<8x1xf32>, vector<8x1xf32>, vector<8x1xf32>, vector<8x2xf32> -> vector<8x8xf32>
    %21 = vector.shape_cast %20 : vector<8x8xf32> to vector<1x8x8xf32>
    %c0_9 = arith.constant 0 : index
    %c0_10 = arith.constant 0 : index
    %c0_11 = arith.constant 0 : index
    %22 = vector.load %arg4[%c0_9, %c0_10, %c0_11] : memref<1x8x8xf32, #tpu.memory_space<vmem>>, vector<1x8x8xf32>
    tpu.vector_store %arg4[%c0_9, %c0_10, %c0_11], %21 {strides = array<i32>} : memref<1x8x8xf32, #tpu.memory_space<vmem>>, vector<1x8x8xf32>,
    return
  }
  func.func @transform_0(%arg0: i32, %arg1: i32) -> (i32, i32) {
    %c0_i32 = arith.constant 0 : i32
    return %arg0, %arg1 : i32, i32
  }
  func.func @transform_1(%arg0: i32, %arg1: i32) -> (i32, i32) {
    %c0_i32 = arith.constant 0 : i32
    return %arg0, %arg1 : i32, i32
  }
  func.func @transform_2(%arg0: i32, %arg1: i32) -> (i32, i32, i32) {
    %c0_i32 = arith.constant 0 : i32
    %c0_i32_0 = arith.constant 0 : i32
    return %arg1, %arg0, %c0_i32 : i32, i32, i32
  }
}

</mosaic_0001>

<bundles_post_ra>
// kernel: tpu_custom_call.1
= control target key start
LH: loop header
LB: loop body
LE: loop exit
PB: predicated region body
PF: predicated region fallthrough
CT: control target
= control target key end

     0   :  { %7 = vsyncpa [#allocation3], 0  ;;  %s227_s0 = inlined_call_operand.hbm [shape: f32[8,256], index: 0, kind: input, shape index: {}]   ;;  %s228_s1 = inlined_call_operand.hbm [shape: f32[8,256], index: 1, kind: input, shape index: {}]   ;;  %s229_s2 = inlined_call_operand.hbm [shape: f32[1,8,8], index: 2, kind: output, shape index: {}]  }
   0x1   :  { %8 = vsyncpa [#allocation6], 0 }
   0x2   :  { %9 = vsyncpa [#allocation4], 0  ;;  %s173_s9 = smov [#allocation2]   ;;  %s174_s11 = smov [#allocation5]  }
   0x3   :  { %s16_s10 = sshll.u32 %s173_s9, 4  ;;  %s26_s12 = sshll.u32 %s174_s11, 4  ;;  %s17_s10 = int_to_ptr.vmem [resolvable:$true] %s16_s10  ;;  %s27_s12 = int_to_ptr.vmem [resolvable:$true] %s26_s12 }
   0x4   :  { %s101_s15 = scalar_lea.hbm %s227_s0, 256 }
   0x5   :  { %p102_p0 = scmp.ne.s32.totalorder %s227_s0, %s101_s15  ;;  %p105_p1 = scmp.lt.u32.totalorder %s101_s15, %s227_s0 }
   0x7   :  { %p107_p2 = pnand %p105_p1, %p102_p0 }
   0x9   :  { %110 = shalt.err (!%p107_p2)
}
   0xa   :  { %s111_s20 = scalar_lea.vmem %s17_s10, 256  ;;  %p116_p4 = scmp.lt.s32.totalorder %s17_s10, %s17_s10 }
   0xb   :  { %p112_p3 = scmp.ne.s32.totalorder %s17_s10, %s111_s20  ;;  %p117_p5 = scmp.lt.s32.totalorder %s111_s20, %s111_s20 }
   0xd   :  { %p118_p6 = por %p117_p5, %p116_p4 }
   0xf   :  { %p119_p7 = pnand %p118_p6, %p112_p3 }
  0x11   :  { %122 = shalt.err (!%p119_p7)
}
  0x12   :  { %19 = dma.hbm_to_vmem [thread:$0]  %s227_s0, 256, %s17_s10, [#allocation3]  }
  0x13   :  { %s123_s25 = scalar_lea.hbm %s228_s1, 256 }
  0x14   :  { %p124_p8 = scmp.ne.s32.totalorder %s228_s1, %s123_s25  ;;  %p127_p9 = scmp.lt.u32.totalorder %s123_s25, %s228_s1 }
  0x16   :  { %p129_p10 = pnand %p127_p9, %p124_p8 }
  0x18   :  { %132 = shalt.err (!%p129_p10)
}
  0x19   :  { %s133_s30 = scalar_lea.vmem %s27_s12, 256  ;;  %p138_p12 = scmp.lt.s32.totalorder %s27_s12, %s27_s12 }
  0x1a   :  { %p134_p11 = scmp.ne.s32.totalorder %s27_s12, %s133_s30  ;;  %p139_p13 = scmp.lt.s32.totalorder %s133_s30, %s133_s30 }
  0x1c   :  { %p140_p0 = por %p139_p13, %p138_p12 }
  0x1e   :  { %p141_p1 = pnand %p140_p0, %p134_p11 }
  0x20   :  { %144 = shalt.err (!%p141_p1)
}
  0x21   :  { %29 = dma.hbm_to_vmem [thread:$0]  %s228_s1, 256, %s27_s12, [#allocation6]  }
  0x22   :  { %167 = dma.done.wait [#allocation3], 256  }
  0x23   :  { %168 = vsyncadd [#allocation3], 4294967040 }
  0x24   :  { %169 = dma.done.wait [#allocation6], 256  }
  0x25   :  { %170 = vsyncadd [#allocation6], 4294967040  ;;  %v36_v0 = vld [vmem:[#allocation2] sm:$0xff]  ;;  %v37_v1 = vld [vmem:[#allocation2 + $0x8] sm:$0xff]  ;;  %vm68_vm0 = vcmask 7168   ;;  %vm70_vm1 = vcmask 15360  }
  0x26   :  { %v38_v2 = vld [vmem:[#allocation5] sm:$0xff]  ;;  %v40_v3 = vadd.f32 %v37_v1, %v36_v0  ;;  %v53_v4 = vmul.f32 %v36_v0, %v36_v0  ;;  %v54_v5 = vmul.f32 %v37_v1, %v37_v1  ;;  %v39_v6 = vld [vmem:[#allocation5 + $0x8] sm:$0xff]  ;;  %vm72_vm2 = vcmask 23552   ;;  %s175_s1 = smov [#allocation7]  }
  0x27   :  { %v58_v7 = vmul.f32 %v38_v2, %v38_v2  ;;  %v43_v8 = vadd.f32 %v39_v6, %v38_v2  ;;  %v59_v9 = vmul.f32 %v39_v6, %v39_v6  ;;  %v63_v10 = vmul.f32 %v38_v2, %v36_v0  ;;  %s88_s4 = sshll.u32 %s175_s1, 4  ;;  %s89_s4 = int_to_ptr.vmem [resolvable:$true] %s88_s4 }
  0x28   :  { %41 = vadd.xlane.f32.xlu0 %v40_v3  ;;  %v55_v11 = vadd.f32 %v54_v5, %v53_v4  ;;  %v64_v12 = vmul.f32 %v39_v6, %v37_v1  ;;  %v46_v13 = vsub.f32 %v36_v0, %v38_v2  ;;  %v47_v14 = vsub.f32 %v37_v1, %v39_v6  ;;  %s145_s5 = scalar_lea.vmem %s89_s4, 128  ;;  %p150_p3 = scmp.lt.s32.totalorder %s89_s4, %s89_s4 }
  0x29   :  { %v60_v15 = vadd.f32 %v59_v9, %v58_v7  ;;  %vm74_vm3 = vcmask 31744   ;;  %vm76_vm4 = vcmask 39936   ;;  %vm78_vm5 = vcmask 48128   ;;  %p146_p2 = scmp.ne.s32.totalorder %s89_s4, %s145_s5  ;;  %p151_p4 = scmp.lt.s32.totalorder %s145_s5, %s145_s5 }
  0x2a   :  { %56 = vadd.xlane.f32.xlu1 %v55_v11  ;;  %v48_v16 = vand.u32 2147483647, %v46_v13  ;;  %v49_v17 = vand.u32 2147483647, %v47_v14  ;;  %v65_v18 = vadd.f32 %v64_v12, %v63_v10  ;;  %vm80_vm6 = vcmask 64512  }
  0x2b   :  { %p152_p5 = por %p151_p4, %p150_p3 }
  0x2c   :  { %44 = vadd.xlane.f32.xlu0 %v43_v8  ;;  %v50_v19 = vadd.f32 %v49_v17, %v48_v16 }
  0x2d   :  { %p153_p6 = pnand %p152_p5, %p146_p2 }
  0x2e   :  { %61 = vadd.xlane.f32.xlu1 %v60_v15 }
  0x30   :  { %66 = vadd.xlane.f32.xlu0 %v65_v18 }
  0x32   :  { %51 = vadd.xlane.f32.xlu1 %v50_v19 }
  0xb5   :  { %v42_v20 = vpop.xlane.xlu0 %41 }
  0xb7   :  { %v57_v21 = vpop.xlane.xlu1 %56 }
  0xb9   :  { %v45_v22 = vpop.xlane.xlu0 %44 }
  0xba   :  { %v69_v23 = vsel %vm68_vm0, %v42_v20, %v45_v22 }
  0xbb   :  { %v62_v24 = vpop.xlane.xlu1 %61  ;;  %v71_v25 = vsel %vm70_vm1, %v69_v23, %v57_v21 }
  0xbc   :  { %v73_v26 = vsel %vm72_vm2, %v71_v25, %v62_v24 }
  0xbd   :  { %v67_v27 = vpop.xlane.xlu0 %66 }
  0xbe   :  { %v75_v28 = vsel %vm74_vm3, %v73_v26, %v67_v27 }
  0xbf   :  { %v52_v29 = vpop.xlane.xlu1 %51 }
  0xc0   :  { %v77_v30 = vsel %vm76_vm4, %v75_v28, %v52_v29 }
  0xc1   :  { %v79_v31 = vsel %vm78_vm5, %v77_v30, 0.0 }
  0xc2   :  { %81 = vst.msk [vmem:[#allocation7] sm:$0xff] %vm80_vm6, %v79_v31 }
  0xc3   :  { %156 = shalt.err (!%p153_p6)
}
  0xc4   :  { %s157_s8 = scalar_lea.hbm %s229_s2, 128 }
  0xc5   :  { %p158_p7 = scmp.ne.s32.totalorder %s229_s2, %s157_s8  ;;  %p161_p8 = scmp.lt.u32.totalorder %s157_s8, %s229_s2 }
  0xc7   :  { %p163_p9 = pnand %p161_p8, %p158_p7 }
  0xc9   :  { %166 = shalt.err (!%p163_p9)
}
  0xca   :  { %91 = dma.vmem_to_hbm [thread:$0]  %s89_s4, 128, %s229_s2, [#allocation4]  }
  0xcb   :  { %171 = dma.done.wait [#allocation4], 128  }
  0xcc   :  { %172 = vsyncadd [#allocation4], 4294967168 }
  0xcd   :  { %95 = vsyncpa [#allocation3], 1 }
  0xce   :  { %96 = vsyncpa [#allocation6], 1 }
  0xcf   :  { %97 = vsyncpa [#allocation4], 1 }

</bundles_post_ra>
